<compile_context>
chip_gen: v7x
topology: tpu7x:2x2x1
jax: 0.10.0
libtpu: 0.0.40
codegen_flags: <defaults>
</compile_context>

<pallas_src>
import functools

import jax
import jax.numpy as jnp
from jax.experimental import pallas as pl
from jax.experimental.pallas import tpu as pltpu

LEAKY_SLOPE = 0.01  # PyTorch nn.LeakyReLU default negative_slope


def _mlp_fused_kernel(*refs, num_layers: int):
    """refs = (x_ref, w0, b0, w1, b1, ..., w_last, b_last, o_ref).

    Layers 0..num_layers-2 get LeakyReLU; the final layer is plain linear.
    All intermediates live in vregs/VMEM — nothing is written back until o_ref.
    """
    x_ref = refs[0]
    o_ref = refs[-1]
    wb = refs[1:-1]
    h = x_ref[...]
    for i in range(num_layers):
        w = wb[2 * i][...]
        b = wb[2 * i + 1][...]          # (1, out) broadcasts over batch
        y = jnp.dot(h, w, preferred_element_type=jnp.float32) + b
        if i < num_layers - 1:
            h = jnp.where(y > 0, y, LEAKY_SLOPE * y)   # LeakyReLU on VPU
        else:
            h = y                                       # final layer: no activation
    o_ref[...] = h.astype(o_ref.dtype)


def mlp_move_forward(x, params):
    """Fused MLPMove forward: one pallas_call for all layers.

    x: (B, n) f32; params: list of (w, b) with w (in, out), b (1, out); last pair is out_layer.
    Returns (B, n*n) f32.
    """
    B, in0 = x.shape
    num_layers = len(params)
    out_dim = params[-1][0].shape[1]

    # Full-array blocks, no grid (block_shape == array dims satisfies the (8,128) rule).
    in_specs = [pl.BlockSpec(x.shape, lambda: (0, 0))]
    flat_args = [x]
    flops = 0
    bytes_accessed = x.size * 4 + B * out_dim * 4
    for (w, b) in params:
        in_specs.append(pl.BlockSpec(w.shape, lambda: (0, 0)))
        in_specs.append(pl.BlockSpec(b.shape, lambda: (0, 0)))
        flat_args.extend([w, b])
        flops += 2 * B * w.shape[0] * w.shape[1]
        bytes_accessed += (w.size + b.size) * 4

    kernel = functools.partial(_mlp_fused_kernel, num_layers=num_layers)
    return pl.pallas_call(
        kernel,
        out_shape=jax.ShapeDtypeStruct((B, out_dim), jnp.float32),
        in_specs=in_specs,
        out_specs=pl.BlockSpec((B, out_dim), lambda: (0, 0)),
        cost_estimate=pl.CostEstimate(
            flops=flops, transcendentals=0, bytes_accessed=bytes_accessed),
    )(*flat_args)
    # NOTE: if batch grows well beyond toy size, add a grid over B with
    # dimension_semantics=("parallel",) and weight index_maps returning (0, 0)
    # so the <200 KiB of weights stays VMEM-resident (and shards across v7x's 2 TCs).


def init_mlp_move_params(key, n, layers):
    """Deterministic init mimicking PyTorch nn.Linear default (U[-1/sqrt(fan_in), 1/sqrt(fan_in)]).

    Returns list of (w, b) with w: (in, out), b: (1, out). Hidden layers = `layers`,
    final out_layer maps layers[-1] -> n*n.
    """
    dims = [n] + list(layers)
    sizes = list(zip(dims[:-1], dims[1:])) + [(dims[-1], n * n)]
    params = []
    for (fan_in, fan_out) in sizes:
        key, kw, kb = jax.random.split(key, 3)
        bound = 1.0 / jnp.sqrt(jnp.float32(fan_in))
        w = jax.random.uniform(kw, (fan_in, fan_out), jnp.float32, -bound, bound)
        b = jax.random.uniform(kb, (1, fan_out), jnp.float32, -bound, bound)
        params.append((w, b))
    return params


def mlp_move_ref(x, params):
    # Pure-JAX reference for a sanity check.
    *hidden, out = params
    for (w, b) in hidden:
        y = x @ w + b
        x = jnp.where(y > 0, y, LEAKY_SLOPE * y)
    w, b = out
    return x @ w + b


if __name__ == "__main__":
    n = 16             # board side -> input features n, output n*n = 256
    layers = [32, 64]  # hidden layer sizes
    batch = 8

    key = jax.random.PRNGKey(0)
    key, kx = jax.random.split(key)
    x = jax.random.normal(kx, (batch, n), jnp.float32)
    params = init_mlp_move_params(key, n, layers)

    out = jax.block_until_ready(mlp_move_forward(x, params))
    ref = mlp_move_ref(x, params)

    assert out.shape == (batch, n * n), out.shape
    assert jnp.allclose(out, ref, atol=1e-4, rtol=1e-4), "mismatch vs reference"
    print("KERNEL_OK")
</pallas_src>

<mosaic_0001>
module attributes {stable_mosaic.version = 11 : i64} {
  func.func @_mlp_fused_kernel(%arg0: memref<8x16xf32, #tpu.memory_space<vmem>>, %arg1: memref<16x32xf32, #tpu.memory_space<vmem>>, %arg2: memref<1x32xf32, #tpu.memory_space<vmem>>, %arg3: memref<32x64xf32, #tpu.memory_space<vmem>>, %arg4: memref<1x64xf32, #tpu.memory_space<vmem>>, %arg5: memref<64x256xf32, #tpu.memory_space<vmem>>, %arg6: memref<1x256xf32, #tpu.memory_space<vmem>>, %arg7: memref<8x256xf32, #tpu.memory_space<vmem>>) attributes {dimension_semantics = [], scalar_prefetch = 0 : i64, scratch_operands = 0 : i64, tpu.core_type = #tpu.core_type<tc>} {
    %c0 = arith.constant 0 : index
    %c0_0 = arith.constant 0 : index
    %0 = vector.load %arg0[%c0, %c0_0] : memref<8x16xf32, #tpu.memory_space<vmem>>, vector<8x16xf32>
    %c0_1 = arith.constant 0 : index
    %c0_2 = arith.constant 0 : index
    %1 = vector.load %arg1[%c0_1, %c0_2] : memref<16x32xf32, #tpu.memory_space<vmem>>, vector<16x32xf32>
    %c0_3 = arith.constant 0 : index
    %c0_4 = arith.constant 0 : index
    %2 = vector.load %arg2[%c0_3, %c0_4] : memref<1x32xf32, #tpu.memory_space<vmem>>, vector<1x32xf32>
    %cst = arith.constant dense<0.000000e+00> : vector<8x32xf32>
    %3 = tpu.matmul %0, %1, %cst {dimension_numbers = #tpu.dot_dimension_numbers<[1], [0], [0], [1], [0, 0, 1, 1], [], []>} : vector<8x16xf32>, vector<16x32xf32>, vector<8x32xf32> -> vector<8x32xf32>
    %4 = vector.broadcast %2 : vector<1x32xf32> to vector<8x32xf32>
    %5 = arith.addf %3, %4 : vector<8x32xf32>
    %cst_5 = arith.constant 0.000000e+00 : f32
    %6 = vector.broadcast %cst_5 : f32 to vector<8x32xf32>
    %7 = arith.cmpf ogt, %5, %6 : vector<8x32xf32>
    %cst_6 = arith.constant 0.00999999977 : f32
    %8 = vector.broadcast %cst_6 : f32 to vector<8x32xf32>
    %9 = arith.mulf %8, %5 : vector<8x32xf32>
    %10 = arith.select %7, %5, %9 : vector<8x32xi1>, vector<8x32xf32>
    %c0_7 = arith.constant 0 : index
    %c0_8 = arith.constant 0 : index
    %11 = vector.load %arg3[%c0_7, %c0_8] : memref<32x64xf32, #tpu.memory_space<vmem>>, vector<32x64xf32>
    %c0_9 = arith.constant 0 : index
    %c0_10 = arith.constant 0 : index
    %12 = vector.load %arg4[%c0_9, %c0_10] : memref<1x64xf32, #tpu.memory_space<vmem>>, vector<1x64xf32>
    %cst_11 = arith.constant dense<0.000000e+00> : vector<8x64xf32>
    %13 = tpu.matmul %10, %11, %cst_11 {dimension_numbers = #tpu.dot_dimension_numbers<[1], [0], [0], [1], [0, 0, 1, 1], [], []>} : vector<8x32xf32>, vector<32x64xf32>, vector<8x64xf32> -> vector<8x64xf32>
    %14 = vector.broadcast %12 : vector<1x64xf32> to vector<8x64xf32>
    %15 = arith.addf %13, %14 : vector<8x64xf32>
    %cst_12 = arith.constant 0.000000e+00 : f32
    %16 = vector.broadcast %cst_12 : f32 to vector<8x64xf32>
    %17 = arith.cmpf ogt, %15, %16 : vector<8x64xf32>
    %cst_13 = arith.constant 0.00999999977 : f32
    %18 = vector.broadcast %cst_13 : f32 to vector<8x64xf32>
    %19 = arith.mulf %18, %15 : vector<8x64xf32>
    %20 = arith.select %17, %15, %19 : vector<8x64xi1>, vector<8x64xf32>
    %c0_14 = arith.constant 0 : index
    %c0_15 = arith.constant 0 : index
    %21 = vector.load %arg5[%c0_14, %c0_15] : memref<64x256xf32, #tpu.memory_space<vmem>>, vector<64x256xf32>
    %c0_16 = arith.constant 0 : index
    %c0_17 = arith.constant 0 : index
    %22 = vector.load %arg6[%c0_16, %c0_17] : memref<1x256xf32, #tpu.memory_space<vmem>>, vector<1x256xf32>
    %cst_18 = arith.constant dense<0.000000e+00> : vector<8x256xf32>
    %23 = tpu.matmul %20, %21, %cst_18 {dimension_numbers = #tpu.dot_dimension_numbers<[1], [0], [0], [1], [0, 0, 1, 1], [], []>} : vector<8x64xf32>, vector<64x256xf32>, vector<8x256xf32> -> vector<8x256xf32>
    %24 = vector.broadcast %22 : vector<1x256xf32> to vector<8x256xf32>
    %25 = arith.addf %23, %24 : vector<8x256xf32>
    %c0_19 = arith.constant 0 : index
    %c0_20 = arith.constant 0 : index
    %26 = vector.load %arg7[%c0_19, %c0_20] : memref<8x256xf32, #tpu.memory_space<vmem>>, vector<8x256xf32>
    tpu.vector_store %arg7[%c0_19, %c0_20], %25 {strides = array<i32>} : memref<8x256xf32, #tpu.memory_space<vmem>>, vector<8x256xf32>,
    return
  }
}

</mosaic_0001>

<bundles_post_ra>
// kernel: tpu_custom_call.1
= control target key start
LH: loop header
LB: loop body
LE: loop exit
PB: predicated region body
PF: predicated region fallthrough
CT: control target
= control target key end

     0   :  { %12 = vsyncpa [#allocation3], 0  ;;  %s692_s0 = inlined_call_operand.hbm [shape: f32[8,16], index: 0, kind: input, shape index: {}]   ;;  %s693_s1 = inlined_call_operand.hbm [shape: f32[16,32], index: 1, kind: input, shape index: {}]   ;;  %s694_s2 = inlined_call_operand.vmem [shape: f32[1,32], index: 2, kind: input, shape index: {}]   ;;  %s695_s3 = inlined_call_operand.hbm [shape: f32[32,64], index: 3, kind: input, shape index: {}]   ;;  %s696_s4 = inlined_call_operand.vmem [shape: f32[1,64], index: 4, kind: input, shape index: {}]   ;;  %s697_s5 = inlined_call_operand.hbm [shape: f32[64,256], index: 5, kind: input, shape index: {}]   ;;  %s698_s6 = inlined_call_operand.vmem [shape: f32[1,256], index: 6, kind: input, shape index: {}]   ;;  %s699_s7 = inlined_call_operand.hbm [shape: f32[8,256], index: 7, kind: output, shape index: {}]  }
   0x1   :  { %13 = vsyncpa [#allocation6], 0 }
   0x2   :  { %14 = vsyncpa [#allocation9], 0 }
   0x3   :  { %15 = vsyncpa [#allocation4], 0  ;;  %s563_s24 = smov [#allocation5]   ;;  %s445_s28 = scalar_lea.hbm %s693_s1, 256 }
   0x4   :  { %s31_s25 = sshll.u32 %s563_s24, 4  ;;  %p446_p0 = scmp.ne.s32.totalorder %s693_s1, %s445_s28  ;;  %s32_s25 = int_to_ptr.vmem [resolvable:$true] %s31_s25 }
   0x5   :  { %p449_p1 = scmp.lt.u32.totalorder %s445_s28, %s693_s1 }
   0x7   :  { %p451_p2 = pnand %p449_p1, %p446_p0 }
   0x9   :  { %454 = shalt.err (!%p451_p2)
}
   0xa   :  { %s455_s10 = scalar_lea.vmem %s32_s25, 256  ;;  %p460_p4 = scmp.lt.s32.totalorder %s32_s25, %s32_s25 }
   0xb   :  { %p456_p3 = scmp.ne.s32.totalorder %s32_s25, %s455_s10  ;;  %p461_p5 = scmp.lt.s32.totalorder %s455_s10, %s455_s10 }
   0xd   :  { %p462_p6 = por %p461_p5, %p460_p4 }
   0xf   :  { %p463_p7 = pnand %p462_p6, %p456_p3 }
  0x11   :  { %466 = shalt.err (!%p463_p7)
}
  0x12   :  { %s564_s11 = smov 128   ;;  %s565_s12 = smov 8  }
  0x13   :  { %37 = dma.hbm_to_vmem [thread:$0]  %s693_s1, 256, %s32_s25, [#allocation6], %s564_s11, %s564_s11, %s565_s12  }
  0x14   :  { %s566_s15 = smov [#allocation2]   ;;  %s567_s17 = smov [#allocation7]  }
  0x15   :  { %s22_s16 = sshll.u32 %s566_s15, 4  ;;  %s45_s18 = sshll.u32 %s567_s17, 4  ;;  %s23_s16 = int_to_ptr.vmem [resolvable:$true] %s22_s16  ;;  %s46_s18 = int_to_ptr.vmem [resolvable:$true] %s45_s18 }
  0x16   :  { %s467_s21 = scalar_lea.hbm %s692_s0, 128 }
  0x17   :  { %p468_p8 = scmp.ne.s32.totalorder %s692_s0, %s467_s21  ;;  %p471_p9 = scmp.lt.u32.totalorder %s467_s21, %s692_s0 }
  0x19   :  { %p473_p10 = pnand %p471_p9, %p468_p8 }
  0x1b   :  { %476 = shalt.err (!%p473_p10)
}
  0x1c   :  { %s477_s1 = scalar_lea.vmem %s23_s16, 128  ;;  %p482_p12 = scmp.lt.s32.totalorder %s23_s16, %s23_s16 }
  0x1d   :  { %p478_p11 = scmp.ne.s32.totalorder %s23_s16, %s477_s1  ;;  %p483_p13 = scmp.lt.s32.totalorder %s477_s1, %s477_s1 }
  0x1f   :  { %p484_p0 = por %p483_p13, %p482_p12 }
  0x21   :  { %p485_p1 = pnand %p484_p0, %p478_p11 }
  0x23   :  { %488 = shalt.err (!%p485_p1)
}
  0x24   :  { %25 = dma.hbm_to_vmem [thread:$0]  %s692_s0, 128, %s23_s16, [#allocation3]  }
  0x25   :  { %s489_s30 = scalar_lea.hbm %s695_s3, 512 }
  0x26   :  { %p490_p2 = scmp.ne.s32.totalorder %s695_s3, %s489_s30  ;;  %p493_p3 = scmp.lt.u32.totalorder %s489_s30, %s695_s3 }
  0x28   :  { %p495_p4 = pnand %p493_p3, %p490_p2 }
  0x2a   :  { %498 = shalt.err (!%p495_p4)
}
  0x2b   :  { %s499_s14 = scalar_lea.vmem %s46_s18, 512  ;;  %p504_p6 = scmp.lt.s32.totalorder %s46_s18, %s46_s18 }
  0x2c   :  { %p500_p5 = scmp.ne.s32.totalorder %s46_s18, %s499_s14  ;;  %p505_p7 = scmp.lt.s32.totalorder %s499_s14, %s499_s14 }
  0x2e   :  { %p506_p8 = por %p505_p7, %p504_p6 }
  0x30   :  { %p507_p9 = pnand %p506_p8, %p500_p5 }
  0x32   :  { %510 = shalt.err (!%p507_p9)
}
  0x33   :  { %51 = dma.hbm_to_vmem [thread:$0]  %s695_s3, 512, %s46_s18, [#allocation6], %s564_s11, %s564_s11, %s565_s12  }
  0x34   :  { %s568_s16 = smov [#allocation8]   ;;  %s511_s21 = scalar_lea.hbm %s697_s5, 2048 }
  0x35   :  { %s59_s17 = sshll.u32 %s568_s16, 4  ;;  %p512_p10 = scmp.ne.s32.totalorder %s697_s5, %s511_s21  ;;  %s60_s17 = int_to_ptr.vmem [resolvable:$true] %s59_s17 }
  0x36   :  { %p515_p11 = scmp.lt.u32.totalorder %s511_s21, %s697_s5 }
  0x38   :  { %p517_p12 = pnand %p515_p11, %p512_p10 }
  0x3a   :  { %520 = shalt.err (!%p517_p12)
}
  0x3b   :  { %s521_s1 = scalar_lea.vmem %s60_s17, 2048  ;;  %p526_p0 = scmp.lt.s32.totalorder %s60_s17, %s60_s17 }
  0x3c   :  { %p522_p13 = scmp.ne.s32.totalorder %s60_s17, %s521_s1  ;;  %p527_p1 = scmp.lt.s32.totalorder %s521_s1, %s521_s1 }
  0x3e   :  { %p528_p2 = por %p527_p1, %p526_p0 }
  0x40   :  { %p529_p3 = pnand %p528_p2, %p522_p13 }
  0x42   :  { %532 = shalt.err (!%p529_p3)
}
  0x43   :  { %s569_s3 = smov 256   ;;  %s570_s11 = smov 16  }
  0x44   :  { %65 = dma.hbm_to_vmem [thread:$0]  %s697_s5, 2048, %s60_s17, [#allocation9], %s569_s3, %s569_s3, %s570_s11  }
  0x45   :  { %555 = dma.done.wait [#allocation3], 128  }
  0x46   :  { %556 = vsyncadd [#allocation3], 4294967168 }
  0x47   :  { %557 = dma.done.wait [#allocation6], 768  }
  0x48   :  { %558 = vsyncadd [#allocation6], 4294966528 }
  0x49   :  { %559 = dma.done.wait [#allocation9], 2048  }
  0x4a   :  { %560 = vsyncadd [#allocation9], 4294965248  ;;  %v571_v0 = vmov 0.0|0.0   ;;  %vm572_vm0 = vmmov 0   ;;  %v573_v1 = vmov 0.0   ;;  %v81_v2 = vld [vmem:[#allocation5] sm:$0xff]  ;;  %v273_v48 = vlaneseq }
  0x4b   :  { %408 = vmatprep.subr.bf16.mxu1 %v571_v0  ;;  %394 = vmatprep.mubr.msk.f32.mxu1 %vm572_vm0, %v573_v1  ;;  %v82_v3 = vld [vmem:[#allocation5 + $0x8] sm:$0xff]  ;;  %v167_v5 = vld [vmem:[#allocation7] sm:$0xff]  ;;  %v168_v6 = vld [vmem:[#allocation7 + $0x8] sm:$0xff]  ;;  %vm90_vm1 = vcmask 130048   ;;  %vm178_vm3 = vcmask 261120   ;;  %vm283_vm5 = vcmask 523264  }
  0x4c   :  { %351 = vmatprep.mubr.f32.mxu0 %v573_v1  ;;  %v409_v4 = vpack.c.bf16 %v82_v3, %v81_v2  ;;  %v80_v7 = vld [vmem:[#allocation2] sm:$0xff]  ;;  %v412_v8 = vpack.c.bf16 %v168_v6, %v167_v5  ;;  %v169_v9 = vld [vmem:[#allocation7 + $0x10] sm:$0xff]  ;;  %v170_v10 = vld [vmem:[#allocation7 + $0x18] sm:$0xff]  ;;  %v274_v49 = vshrl.u32 %v273_v48, 7  ;;  %s574_s30 = smov [#allocation10]  }
  0x4d   :  { %v415_v11 = vpack.c.bf16 %v170_v10, %v169_v9  ;;  %v256_v12 = vld [vmem:[#allocation8 + $0x8] sm:$0xff]  ;;  %v258_v13 = vld [vmem:[#allocation8 + $0x18] sm:$0xff]  ;;  %v255_v14 = vld [vmem:[#allocation8] sm:$0xff] }
  0x4e   :  { %410 = vmatpush3.bf16.msra.mxu1 %v409_v4  ;;  %v417_v15 = vpack.c.bf16 %v258_v13, %v256_v12  ;;  %v257_v16 = vld [vmem:[#allocation8 + $0x10] sm:$0xff]  ;;  %v260_v17 = vld [vmem:[#allocation8 + $0x28] sm:$0xff]  ;;  %v262_v18 = vld [vmem:[#allocation8 + $0x38] sm:$0xff]  ;;  %v275_v50 = vsub.s32 0, %v274_v49  ;;  %v279_v52 = vsub.s32 1, %v274_v49 }
  0x4f   :  { %411 = vmatprep.subr.bf16.mxu1 %v571_v0  ;;  %v419_v19 = vpack.c.bf16 %v257_v16, %v255_v14  ;;  %v421_v20 = vpack.c.bf16 %v262_v18, %v260_v17  ;;  %v259_v21 = vld [vmem:[#allocation8 + $0x20] sm:$0xff]  ;;  %v261_v22 = vld [vmem:[#allocation8 + $0x30] sm:$0xff]  ;;  %v264_v23 = vld [vmem:[#allocation8 + $0x48] sm:$0xff] }
  0x50   :  { %418 = vmatprep.subr.bf16.mxu0 %v417_v15  ;;  %v266_v24 = vld [vmem:[#allocation8 + $0x58] sm:$0xff]  ;;  %v423_v25 = vpack.c.bf16 %v261_v22, %v259_v21  ;;  %v263_v27 = vld [vmem:[#allocation8 + $0x40] sm:$0xff]  ;;  %v265_v28 = vld [vmem:[#allocation8 + $0x50] sm:$0xff] }
  0x51   :  { %395 = vmatmul.mubr.msk.f32.vlgmr.msra.gmra.mrb[0].mxu1 %vm90_vm1, %v80_v7  ;;  %420 = vmatpush1.bf16.msra.mxu0 %v419_v19  ;;  %v425_v26 = vpack.c.bf16 %v266_v24, %v264_v23  ;;  %v427_v29 = vpack.c.bf16 %v265_v28, %v263_v27  ;;  %v377_v30 = vld [vmem:[%s694_s2] ss:$0 sm:$0xff]  ;;  %v270_v37 = vld [vmem:[#allocation8 + $0x78] sm:$0xff]  ;;  %v267_v39 = vld [vmem:[#allocation8 + $0x60] sm:$0xff] }
  0x52   :  { %413 = vmatpush3.bf16.msra.mxu1 %v412_v8  ;;  %405 = vmatprep.mubr.msk.f32.mxu1 %vm572_vm0, %v573_v1  ;;  %v268_v36 = vld [vmem:[#allocation8 + $0x68] sm:$0xff]  ;;  %v269_v40 = vld [vmem:[#allocation8 + $0x70] sm:$0xff] }
  0x53   :  { %414 = vmatprep.subr.bf16.mxu1 %v571_v0  ;;  %422 = vmatprep.subr.bf16.mxu0 %v421_v20  ;;  %v429_v38 = vpack.c.bf16 %v270_v37, %v268_v36  ;;  %v431_v41 = vpack.c.bf16 %v269_v40, %v267_v39  ;;  %v379_v42 = vld [vmem:[%s696_s4] ss:$0 sm:$0xff]  ;;  %s366_s4 = sshll.u32 %s574_s30, 4  ;;  %s367_s4 = int_to_ptr.vmem [resolvable:$true] %s366_s4 }
  0x54   :  { %v271_v51 = vld [vmem:[%s698_s6] sm:$0x3]  ;;  %s533_s8 = scalar_lea.vmem %s367_s4, 256  ;;  %p538_p5 = scmp.lt.s32.totalorder %s367_s4, %s367_s4 }
  0x55   :  { %424 = vmatpush1.bf16.msra.mxu0 %v423_v25  ;;  %v276_v53 = vrot.slane %v271_v51, %v275_v50  ;;  %v280_v54 = vrot.slane %v271_v51, %v279_v52  ;;  %p534_p4 = scmp.ne.s32.totalorder %s367_s4, %s533_s8  ;;  %p539_p6 = scmp.lt.s32.totalorder %s533_s8, %s533_s8 }
  0x56   :  { %416 = vmatpush3.bf16.msra.mxu1 %v415_v11  ;;  %426 = vmatprep.subr.bf16.mxu0 %v425_v26 }
  0x57   :  { %p540_p7 = por %p539_p6, %p538_p5 }
  0x59   :  { %428 = vmatpush1.bf16.msra.mxu0 %v427_v29  ;;  %p541_p8 = pnand %p540_p7, %p534_p4 }
  0x5a   :  { %430 = vmatprep.subr.bf16.mxu0 %v429_v38 }
  0x5d   :  { %432 = vmatpush1.bf16.msra.mxu0 %v431_v41 }
 0x124   :  { %v160_v31 = vpop.f32.mrb[0].mxu1 }
 0x125   :  { %v161_v32 = vadd.f32 %v377_v30, %v160_v31  ;;  %v396_v33 = vpop.f32.mrb[1].mxu1 }
 0x127   :  { %vm164_vm2 = vcmp.gt.f32.partialorder %v161_v32, 0.0  ;;  %v165_v34 = vmul.f32 0.01, %v161_v32 }
 0x129   :  { %v166_v35 = vsel %vm164_vm2, %v161_v32, %v165_v34 }
 0x12a   :  { %406 = vmatmul.mubr.msk.f32.vlgmr.msra.gmra.mrb[2].mxu1 %vm178_vm3, %v166_v35 }
 0x1fd   :  { %v248_v43 = vpop.f32.mrb[2].mxu1 }
 0x1fe   :  { %v249_v44 = vadd.f32 %v379_v42, %v248_v43  ;;  %v407_v45 = vpop.f32.mrb[3].mxu1 }
 0x200   :  { %vm252_vm4 = vcmp.gt.f32.partialorder %v249_v44, 0.0  ;;  %v253_v46 = vmul.f32 0.01, %v249_v44 }
 0x202   :  { %v254_v47 = vsel %vm252_vm4, %v249_v44, %v253_v46 }
 0x203   :  { %381 = vmatmul.mubr.msk.f32.vlgmr.msra.gmra.mrb[0].mxu0 %vm283_vm5, %v254_v47 }
 0x2d6   :  { %v353_v55 = vpop.f32.mrb[0].mxu0 }
 0x2d7   :  { %v354_v56 = vadd.f32 %v353_v55, %v276_v53  ;;  %v355_v57 = vpop.f32.mrb[1].mxu0 }
 0x2d8   :  { %v356_v58 = vadd.f32 %v355_v57, %v280_v54 }
 0x2d9   :  { %358 = vst [vmem:[#allocation10] sm:$0xff] %v354_v56 }
 0x2da   :  { %359 = vst [vmem:[#allocation10 + $0x8] sm:$0xff] %v356_v58 }
 0x2db   :  { %544 = shalt.err (!%p541_p8)
}
 0x2dc   :  { %s545_s10 = scalar_lea.hbm %s699_s7, 256 }
 0x2dd   :  { %p546_p9 = scmp.ne.s32.totalorder %s699_s7, %s545_s10  ;;  %p549_p10 = scmp.lt.u32.totalorder %s545_s10, %s699_s7 }
 0x2df   :  { %p551_p11 = pnand %p549_p10, %p546_p9 }
 0x2e1   :  { %554 = shalt.err (!%p551_p11)
}
 0x2e2   :  { %369 = dma.vmem_to_hbm [thread:$0]  %s367_s4, 256, %s699_s7, [#allocation4]  }
 0x2e3   :  { %561 = dma.done.wait [#allocation4], 256  }
 0x2e4   :  { %562 = vsyncadd [#allocation4], 4294967040 }
 0x2e5   :  { %373 = vsyncpa [#allocation3], 1 }
 0x2e6   :  { %374 = vsyncpa [#allocation6], 1 }
 0x2e7   :  { %375 = vsyncpa [#allocation9], 1 }
 0x2e8   :  { %376 = vsyncpa [#allocation4], 1 }

</bundles_post_ra>
